<compile_context>
chip_gen: v7x
topology: tpu7x:2x2x1
jax: 0.10.0
libtpu: 0.0.40
codegen_flags: <defaults>
</compile_context>

<pallas_src>
import jax
import jax.numpy as jnp
from jax import lax
from jax.experimental import pallas as pl
from jax.experimental.pallas import tpu as pltpu

BN_EPS = 1e-5
# MXU operand precision (accumulation is always f32).  bf16 is the fast MXU
# path on v5e/v6e/v7x; it is also used as the storage dtype of the conv input
# and the y1 intermediate (halves HBM traffic on the bandwidth-bound passes).
MXU_OPERAND_DTYPE = jnp.bfloat16

_COMPILER_PARAMS = pltpu.CompilerParams(
    dimension_semantics=("parallel",),
    vmem_limit_bytes=32 * 1024 * 1024,
)


# ---------------------------------------------------------------------------
# In-kernel conv helper
# ---------------------------------------------------------------------------
def _conv3x3_rows(z, m_ref, bt, h, wc):
    """3x3 'same' conv of lane-dense rows via three MXU dots.

    z: (bt, H, W*Cin) activation rows (values outside the image are handled by
       the explicit zero halo rows built here; the W padding is encoded in the
       block-Toeplitz slab).
    m_ref: (3*W*Cin, W*Cout) weight slab ref.
    Returns the f32 accumulator of shape (bt*H, W*Cout).
    """
    zrow = jnp.zeros((bt, 1, wc), z.dtype)
    zp = jnp.concatenate([zrow, z, zrow], axis=1)          # (bt, H+2, wc)
    acc = jnp.zeros((bt * h, wc), jnp.float32)
    for kh in range(3):                                    # static unroll
        a = zp[:, kh:kh + h, :].reshape(bt * h, wc)        # (bt*H, wc)
        acc = acc + jnp.dot(a, m_ref[kh * wc:(kh + 1) * wc, :],
                            preferred_element_type=jnp.float32)
    return acc


def _stats_from_acc(acc):
    """Per-lane [sum, sum_of_squares] of the f32 accumulator -> (1, 2, wc)."""
    s0 = jnp.sum(acc, axis=0, keepdims=True)
    s1 = jnp.sum(acc * acc, axis=0, keepdims=True)
    return jnp.concatenate([s0, s1], axis=0)[None]


# ---------------------------------------------------------------------------
# Kernels
# ---------------------------------------------------------------------------
def _conv_stats_kernel(x_ref, m_ref, y_ref, s_ref):
    """conv1 on one batch tile + per-lane BN partial statistics.

    x_ref: (bt, H, W*Cin)    bf16 input rows (unpadded)
    m_ref: (3*W*Cin, W*Cout) block-Toeplitz weight slab (bf16)
    y_ref: (bt, H, W*Cout)   raw conv output (bf16 storage)
    s_ref: (1, 2, W*Cout)    per-lane [sum, sum_of_squares] over this tile
    """
    bt, h, wc = x_ref.shape
    acc = _conv3x3_rows(x_ref[...].astype(m_ref.dtype), m_ref, bt, h, wc)
    y_ref[...] = acc.reshape(bt, h, wc).astype(y_ref.dtype)
    s_ref[...] = _stats_from_acc(acc)        # stats from f32 acc (exact)


def _bn_relu_conv_stats_kernel(y1_ref, sc_ref, sh_ref, m_ref, y2_ref, s_ref):
    """bn1 (precomputed per-lane scale/shift) + relu + conv2 on one batch tile.

    y1_ref: (bt, H, W*C)  raw conv1 output (bf16)
    sc_ref / sh_ref: (1, W*C) per-lane BN scale / shift (f32)
    m_ref: (3*W*C, W*C)   conv2 block-Toeplitz slab (bf16)
    y2_ref: (bt, H, W*C)  raw conv2 output (f32, later aliased to the output)
    s_ref:  (1, 2, W*C)   per-lane [sum, sum_of_squares] over this tile
    """
    bt, h, wc = y1_ref.shape
    z = jnp.maximum(y1_ref[...].astype(jnp.float32) * sc_ref[...]
                    + sh_ref[...], 0.0)                       # bn1 + relu
    acc = _conv3x3_rows(z.astype(m_ref.dtype), m_ref, bt, h, wc)
    y2_ref[...] = acc.reshape(bt, h, wc).astype(y2_ref.dtype)
    s_ref[...] = _stats_from_acc(acc)


def _bn_add_relu_kernel(y2_ref, sc_ref, sh_ref, xres_ref, o_ref):
    """bn2 + residual add + relu on one batch tile (lane-dense f32 VPU)."""
    out = (y2_ref[...].astype(jnp.float32) * sc_ref[...] + sh_ref[...]
           + xres_ref[...].astype(jnp.float32))
    o_ref[...] = jnp.maximum(out, 0.0).astype(o_ref.dtype)


# ---------------------------------------------------------------------------
# pallas_call wrappers (batch-tiled grid, double-buffered BlockSpecs)
# ---------------------------------------------------------------------------
def _conv_pass(x_rows, m, bt):
    n, h, wc = x_rows.shape
    steps = n // bt
    return pl.pallas_call(
        _conv_stats_kernel,
        grid=(steps,),
        in_specs=[
            pl.BlockSpec((bt, h, wc), lambda i: (i, 0, 0)),
            pl.BlockSpec(m.shape, lambda i: (0, 0)),
        ],
        out_specs=[
            pl.BlockSpec((bt, h, wc), lambda i: (i, 0, 0)),
            pl.BlockSpec((1, 2, wc), lambda i: (i, 0, 0)),
        ],
        out_shape=[
            jax.ShapeDtypeStruct((n, h, wc), MXU_OPERAND_DTYPE),   # y1 bf16
            jax.ShapeDtypeStruct((steps, 2, wc), jnp.float32),
        ],
        compiler_params=_COMPILER_PARAMS,
    )(x_rows, m)


def _bn_relu_conv_pass(y1, scale, shift, m, bt):
    n, h, wc = y1.shape
    steps = n // bt
    return pl.pallas_call(
        _bn_relu_conv_stats_kernel,
        grid=(steps,),
        in_specs=[
            pl.BlockSpec((bt, h, wc), lambda i: (i, 0, 0)),
            pl.BlockSpec((1, wc), lambda i: (0, 0)),
            pl.BlockSpec((1, wc), lambda i: (0, 0)),
            pl.BlockSpec(m.shape, lambda i: (0, 0)),
        ],
        out_specs=[
            pl.BlockSpec((bt, h, wc), lambda i: (i, 0, 0)),
            pl.BlockSpec((1, 2, wc), lambda i: (i, 0, 0)),
        ],
        out_shape=[
            jax.ShapeDtypeStruct((n, h, wc), jnp.float32),         # y2 f32
            jax.ShapeDtypeStruct((steps, 2, wc), jnp.float32),
        ],
        compiler_params=_COMPILER_PARAMS,
    )(y1, scale, shift, m)


def _bn_add_relu_pass(y2, scale, shift, x_res, out_dtype, bt):
    n, h, wc = y2.shape
    steps = n // bt
    # Alias y2 -> output when dtypes match: saves one HBM allocation/writeback.
    aliases = {0: 0} if y2.dtype == out_dtype else {}
    return pl.pallas_call(
        _bn_add_relu_kernel,
        grid=(steps,),
        in_specs=[
            pl.BlockSpec((bt, h, wc), lambda i: (i, 0, 0)),
            pl.BlockSpec((1, wc), lambda i: (0, 0)),
            pl.BlockSpec((1, wc), lambda i: (0, 0)),
            pl.BlockSpec((bt, h, wc), lambda i: (i, 0, 0)),
        ],
        out_specs=pl.BlockSpec((bt, h, wc), lambda i: (i, 0, 0)),
        out_shape=jax.ShapeDtypeStruct((n, h, wc), out_dtype),
        input_output_aliases=aliases,
        compiler_params=_COMPILER_PARAMS,
    )(y2, scale, shift, x_res)


# ---------------------------------------------------------------------------
# Host-side helpers
# ---------------------------------------------------------------------------
def _pick_batch_tile(n, h, wc, target_rows=256,
                     vmem_budget_bytes=8 * 1024 * 1024):
    """Batch-tile size: divides N, keeps >= 2 grid steps when possible (v7x
    megacore), aims for B_tile*H >= target_rows, and stays inside a
    conservative per-step VMEM budget (bf16 in + f32 out, double-buffered)."""
    divisors = [d for d in range(1, n + 1) if n % d == 0]

    def fits(bt):
        return bt * h * wc * (2 + 4) * 2 <= vmem_budget_bytes

    divisors = [d for d in divisors if fits(d)] or [1]
    cands = [d for d in divisors if n // d >= 2] or divisors
    good = [d for d in cands if d * h >= target_rows]
    return min(good) if good else max(cands)


def _toeplitz_weight_slab(wk, w_dim):
    """Fold (3,3,Cin,Cout) HWIO weights into a (3*W*Cin, W*Cout) slab.

    M[kh*W*Cin + w_in*Cin + ci, w_out*Cout + co] = wk[kh, w_in - w_out + 1, ci, co]
    when |w_in - w_out| <= 1 else 0.  The kw band encodes the W 'same' padding,
    so the kernel never slices / shifts along the W (lane) axis.
    """
    _, _, cin, cout = wk.shape
    w_in = jnp.arange(w_dim)
    w_out = jnp.arange(w_dim)
    kw = jnp.arange(3)
    band = (w_in[None, :, None] == w_out[None, None, :] + kw[:, None, None] - 1)
    band = band.astype(wk.dtype)                                   # (3, W, W)
    m = jnp.einsum("kab,hkcd->hacbd", band, wk)                    # (3,W,Cin,W,Cout)
    return m.reshape(3 * w_dim * cin, w_dim * cout)


def _bn_scale_shift(stats, gamma, beta, count, w_dim, c_dim):
    """Fold per-step per-lane [sum, sumsq] partials -> per-lane scale/shift."""
    s = stats.reshape(-1, 2, w_dim, c_dim).sum(axis=(0, 2))        # (2, C)
    mean = s[0] / count
    var = s[1] / count - mean * mean          # biased var, training-mode BN
    rstd = lax.rsqrt(var + BN_EPS)
    scale = gamma * rstd
    shift = beta - mean * scale
    # expand per-channel -> per-lane (lane index = w*C + c)
    return jnp.tile(scale, w_dim)[None, :], jnp.tile(shift, w_dim)[None, :]


def basic_block_forward(x_nchw, w1, w2, g1, b1, g2, b2):
    """x_nchw: (N, C, H, W); w1/w2: (3, 3, Cin, Cout) HWIO; g*/b*: (C,)."""
    n, c, h, w = x_nchw.shape
    cout = w1.shape[-1]
    assert c == cout, "stride=1 / identity residual path only"
    wc = w * c
    count = n * h * w
    bt = _pick_batch_tile(n, h, wc)

    # Lane-dense rows (last dim = W*C).  bf16 copy feeds the MXU passes;
    # the f32 rows are kept for the residual add.
    x_rows = jnp.transpose(x_nchw, (0, 2, 3, 1)).reshape(n, h, wc)
    x_bf16 = x_rows.astype(MXU_OPERAND_DTYPE)
    x_res = x_rows.astype(jnp.float32)

    m1 = _toeplitz_weight_slab(w1, w).astype(MXU_OPERAND_DTYPE)
    m2 = _toeplitz_weight_slab(w2, w).astype(MXU_OPERAND_DTYPE)

    y1, s1 = _conv_pass(x_bf16, m1, bt)                      # conv1 + stats
    scale1, shift1 = _bn_scale_shift(s1, g1, b1, count, w, c)
    y2, s2 = _bn_relu_conv_pass(y1, scale1, shift1, m2, bt)  # bn1+relu+conv2
    scale2, shift2 = _bn_scale_shift(s2, g2, b2, count, w, c)
    out_rows = _bn_add_relu_pass(y2, scale2, shift2, x_res, jnp.float32, bt)

    out = jnp.transpose(out_rows.reshape(n, h, w, c), (0, 3, 1, 2))
    return out.astype(x_nchw.dtype)                          # NCHW


# ---------------------------------------------------------------------------
# Pure-JAX reference (module semantics) for the self-check
# ---------------------------------------------------------------------------
def _reference_forward(x_nchw, w1, w2, g1, b1, g2, b2, conv_dtype=jnp.float32):
    x = jnp.transpose(x_nchw, (0, 2, 3, 1)).astype(jnp.float32)
    dn = lax.conv_dimension_numbers(x.shape, w1.shape, ("NHWC", "HWIO", "NHWC"))

    def conv(u, wk):
        return lax.conv_general_dilated(
            u.astype(conv_dtype), wk.astype(conv_dtype), (1, 1), "SAME",
            dimension_numbers=dn, preferred_element_type=jnp.float32)

    def bn(y, g, b):
        m = jnp.mean(y, axis=(0, 1, 2), keepdims=True)
        v = jnp.mean((y - m) ** 2, axis=(0, 1, 2), keepdims=True)
        return (y - m) * lax.rsqrt(v + BN_EPS) * g.reshape(1, 1, 1, -1) \
            + b.reshape(1, 1, 1, -1)

    y = jnp.maximum(bn(conv(x, w1), g1, b1), 0.0)
    y = bn(conv(y, w2), g2, b2)
    y = jnp.maximum(y + x, 0.0)
    return jnp.transpose(y, (0, 3, 1, 2))


if __name__ == "__main__":
    # W*C = 16*8 = 128 -> exactly one lane-dense vreg row per (n, h).
    N, C, H, W = 2, 8, 16, 16
    key = jax.random.PRNGKey(0)
    kx, k1, k2 = jax.random.split(key, 3)

    x = jax.random.normal(kx, (N, C, H, W), dtype=jnp.float32)

    # conv3x3 weights, HWIO layout, kaiming-ish deterministic init (bias=False).
    std = (2.0 / (9 * C)) ** 0.5
    w1 = jax.random.normal(k1, (3, 3, C, C), dtype=jnp.float32) * std
    w2 = jax.random.normal(k2, (3, 3, C, C), dtype=jnp.float32) * std

    # Fresh BatchNorm2d parameters: gamma=1, beta=0.
    g1 = jnp.ones((C,), jnp.float32)
    b1 = jnp.zeros((C,), jnp.float32)
    g2 = jnp.ones((C,), jnp.float32)
    b2 = jnp.zeros((C,), jnp.float32)

    out = jax.block_until_ready(
        jax.jit(basic_block_forward)(x, w1, w2, g1, b1, g2, b2))
    assert out.shape == (N, C, H, W)

    # Check vs a reference using the same bf16 MXU-operand precision.  The
    # kernel additionally stores y1 in bf16 (bandwidth optimization), so the
    # tolerance is a bit looser than pure operand-rounding parity.
    ref_matched = jax.block_until_ready(
        _reference_forward(x, w1, w2, g1, b1, g2, b2,
                           conv_dtype=MXU_OPERAND_DTYPE))
    assert jnp.max(jnp.abs(out - ref_matched)) < 6e-2

    # Loose check vs the exact f32 module semantics (bf16 MXU operands and
    # bf16 intermediate storage are the intended fast path; f32 accumulation
    # and f32 BN statistics throughout).
    ref_f32 = jax.block_until_ready(
        _reference_forward(x, w1, w2, g1, b1, g2, b2))
    assert jnp.max(jnp.abs(out - ref_f32)) < 2e-1

    print("KERNEL_OK")
</pallas_src>

<mosaic_0001>
module attributes {stable_mosaic.version = 11 : i64} {
  func.func @_conv_stats_kernel(%arg0: i32, %arg1: memref<1x16x128xbf16, #tpu.memory_space<vmem>>, %arg2: memref<384x128xbf16, #tpu.memory_space<vmem>>, %arg3: memref<1x16x128xbf16, #tpu.memory_space<vmem>>, %arg4: memref<1x2x128xf32, #tpu.memory_space<vmem>>) attributes {dimension_semantics = [#tpu.dimension_semantics<parallel>], iteration_bounds = array<i64: 2>, scalar_prefetch = 0 : i64, scratch_operands = 0 : i64, tpu.core_type = #tpu.core_type<tc>, window_params = [{transform_indices = @transform_0, window_bounds = array<i64: 1, 16, 128>}, {pipeline_mode = #tpu.pipeline_mode<synchronous>, transform_indices = @transform_1, window_bounds = array<i64: 384, 128>}, {transform_indices = @transform_2, window_bounds = array<i64: 1, 16, 128>}, {transform_indices = @transform_3, window_bounds = array<i64: 1, 2, 128>}]} {
    %c0 = arith.constant 0 : index
    %c0_0 = arith.constant 0 : index
    %c0_1 = arith.constant 0 : index
    %0 = vector.load %arg1[%c0, %c0_0, %c0_1] : memref<1x16x128xbf16, #tpu.memory_space<vmem>>, vector<1x16x128xbf16>
    %cst = arith.constant 0.000000e+00 : bf16
    %1 = vector.broadcast %cst : bf16 to vector<1x1x128xbf16>
    %2 = tpu.concatenate %1, %0, %1 in 1 : vector<1x1x128xbf16>, vector<1x16x128xbf16>, vector<1x1x128xbf16> -> vector<1x18x128xbf16>
    %cst_2 = arith.constant 0.000000e+00 : f32
    %3 = vector.broadcast %cst_2 : f32 to vector<16x128xf32>
    %4 = vector.extract_strided_slice %2 {offsets = [0, 0, 0], sizes = [1, 16, 128], strides = [1, 1, 1]} : vector<1x18x128xbf16> to vector<1x16x128xbf16>
    %5 = vector.shape_cast %4 : vector<1x16x128xbf16> to vector<16x128xbf16>
    %c0_3 = arith.constant 0 : index
    %c0_4 = arith.constant 0 : index
    %6 = vector.load %arg2[%c0_3, %c0_4] : memref<384x128xbf16, #tpu.memory_space<vmem>>, vector<128x128xbf16>
    %cst_5 = arith.constant dense<0.000000e+00> : vector<16x128xf32>
    %7 = tpu.matmul %5, %6, %cst_5 {dimension_numbers = #tpu.dot_dimension_numbers<[1], [0], [0], [1], [0, 0, 1, 1], [], []>} : vector<16x128xbf16>, vector<128x128xbf16>, vector<16x128xf32> -> vector<16x128xf32>
    %8 = arith.addf %3, %7 : vector<16x128xf32>
    %9 = vector.extract_strided_slice %2 {offsets = [0, 1, 0], sizes = [1, 16, 128], strides = [1, 1, 1]} : vector<1x18x128xbf16> to vector<1x16x128xbf16>
    %10 = vector.shape_cast %9 : vector<1x16x128xbf16> to vector<16x128xbf16>
    %c128 = arith.constant 128 : index
    %c0_6 = arith.constant 0 : index
    %11 = vector.load %arg2[%c128, %c0_6] : memref<384x128xbf16, #tpu.memory_space<vmem>>, vector<128x128xbf16>
    %cst_7 = arith.constant dense<0.000000e+00> : vector<16x128xf32>
    %12 = tpu.matmul %10, %11, %cst_7 {dimension_numbers = #tpu.dot_dimension_numbers<[1], [0], [0], [1], [0, 0, 1, 1], [], []>} : vector<16x128xbf16>, vector<128x128xbf16>, vector<16x128xf32> -> vector<16x128xf32>
    %13 = arith.addf %8, %12 : vector<16x128xf32>
    %14 = vector.extract_strided_slice %2 {offsets = [0, 2, 0], sizes = [1, 16, 128], strides = [1, 1, 1]} : vector<1x18x128xbf16> to vector<1x16x128xbf16>
    %15 = vector.shape_cast %14 : vector<1x16x128xbf16> to vector<16x128xbf16>
    %c256 = arith.constant 256 : index
    %c0_8 = arith.constant 0 : index
    %16 = vector.load %arg2[%c256, %c0_8] : memref<384x128xbf16, #tpu.memory_space<vmem>>, vector<128x128xbf16>
    %cst_9 = arith.constant dense<0.000000e+00> : vector<16x128xf32>
    %17 = tpu.matmul %15, %16, %cst_9 {dimension_numbers = #tpu.dot_dimension_numbers<[1], [0], [0], [1], [0, 0, 1, 1], [], []>} : vector<16x128xbf16>, vector<128x128xbf16>, vector<16x128xf32> -> vector<16x128xf32>
    %18 = arith.addf %13, %17 : vector<16x128xf32>
    %19 = vector.shape_cast %18 : vector<16x128xf32> to vector<1x16x128xf32>
    %20 = arith.truncf %19 : vector<1x16x128xf32> to vector<1x16x128xbf16>
    %c0_10 = arith.constant 0 : index
    %c0_11 = arith.constant 0 : index
    %c0_12 = arith.constant 0 : index
    %21 = vector.load %arg3[%c0_10, %c0_11, %c0_12] : memref<1x16x128xbf16, #tpu.memory_space<vmem>>, vector<1x16x128xbf16>
    tpu.vector_store %arg3[%c0_10, %c0_11, %c0_12], %20 {strides = array<i32>} : memref<1x16x128xbf16, #tpu.memory_space<vmem>>, vector<1x16x128xbf16>,
    %cst_13 = arith.constant dense<0.000000e+00> : vector<128xf32>
    %22 = vector.multi_reduction <add>, %18, %cst_13 [0] : vector<16x128xf32> to vector<128xf32>
    %23 = vector.shape_cast %22 : vector<128xf32> to vector<1x128xf32>
    %24 = arith.mulf %18, %18 : vector<16x128xf32>
    %cst_14 = arith.constant dense<0.000000e+00> : vector<128xf32>
    %25 = vector.multi_reduction <add>, %24, %cst_14 [0] : vector<16x128xf32> to vector<128xf32>
    %26 = vector.shape_cast %25 : vector<128xf32> to vector<1x128xf32>
    %27 = tpu.concatenate %23, %26 in 0 : vector<1x128xf32>, vector<1x128xf32> -> vector<2x128xf32>
    %28 = vector.shape_cast %27 : vector<2x128xf32> to vector<1x2x128xf32>
    %c0_15 = arith.constant 0 : index
    %c0_16 = arith.constant 0 : index
    %c0_17 = arith.constant 0 : index
    %29 = vector.load %arg4[%c0_15, %c0_16, %c0_17] : memref<1x2x128xf32, #tpu.memory_space<vmem>>, vector<1x2x128xf32>
    tpu.vector_store %arg4[%c0_15, %c0_16, %c0_17], %28 {strides = array<i32>} : memref<1x2x128xf32, #tpu.memory_space<vmem>>, vector<1x2x128xf32>,
    return
  }
  func.func @transform_0(%arg0: i32) -> (i32, i32, i32) {
    %c0_i32 = arith.constant 0 : i32
    %c0_i32_0 = arith.constant 0 : i32
    %c0_i32_1 = arith.constant 0 : i32
    return %arg0, %c0_i32, %c0_i32_0 : i32, i32, i32
  }
  func.func @transform_1(%arg0: i32) -> (i32, i32) {
    %c0_i32 = arith.constant 0 : i32
    %c0_i32_0 = arith.constant 0 : i32
    %c0_i32_1 = arith.constant 0 : i32
    return %c0_i32, %c0_i32_0 : i32, i32
  }
  func.func @transform_2(%arg0: i32) -> (i32, i32, i32) {
    %c0_i32 = arith.constant 0 : i32
    %c0_i32_0 = arith.constant 0 : i32
    %c0_i32_1 = arith.constant 0 : i32
    return %arg0, %c0_i32, %c0_i32_0 : i32, i32, i32
  }
  func.func @transform_3(%arg0: i32) -> (i32, i32, i32) {
    %c0_i32 = arith.constant 0 : i32
    %c0_i32_0 = arith.constant 0 : i32
    %c0_i32_1 = arith.constant 0 : i32
    return %arg0, %c0_i32, %c0_i32_0 : i32, i32, i32
  }
}

module attributes {stable_mosaic.version = 11 : i64} {
  func.func @_bn_relu_conv_stats_kernel(%arg0: i32, %arg1: memref<1x16x128xbf16, #tpu.memory_space<vmem>>, %arg2: memref<1x128xf32, #tpu.memory_space<vmem>>, %arg3: memref<1x128xf32, #tpu.memory_space<vmem>>, %arg4: memref<384x128xbf16, #tpu.memory_space<vmem>>, %arg5: memref<1x16x128xf32, #tpu.memory_space<vmem>>, %arg6: memref<1x2x128xf32, #tpu.memory_space<vmem>>) attributes {dimension_semantics = [#tpu.dimension_semantics<parallel>], iteration_bounds = array<i64: 2>, scalar_prefetch = 0 : i64, scratch_operands = 0 : i64, tpu.core_type = #tpu.core_type<tc>, window_params = [{transform_indices = @transform_0, window_bounds = array<i64: 1, 16, 128>}, {pipeline_mode = #tpu.pipeline_mode<synchronous>, transform_indices = @transform_1, window_bounds = array<i64: 1, 128>}, {pipeline_mode = #tpu.pipeline_mode<synchronous>, transform_indices = @transform_2, window_bounds = array<i64: 1, 128>}, {pipeline_mode = #tpu.pipeline_mode<synchronous>, transform_indices = @transform_3, window_bounds = array<i64: 384, 128>}, {transform_indices = @transform_4, window_bounds = array<i64: 1, 16, 128>}, {transform_indices = @transform_5, window_bounds = array<i64: 1, 2, 128>}]} {
    %c0 = arith.constant 0 : index
    %c0_0 = arith.constant 0 : index
    %c0_1 = arith.constant 0 : index
    %0 = vector.load %arg1[%c0, %c0_0, %c0_1] : memref<1x16x128xbf16, #tpu.memory_space<vmem>>, vector<1x16x128xbf16>
    %1 = arith.extf %0 : vector<1x16x128xbf16> to vector<1x16x128xf32>
    %c0_2 = arith.constant 0 : index
    %c0_3 = arith.constant 0 : index
    %2 = vector.load %arg2[%c0_2, %c0_3] : memref<1x128xf32, #tpu.memory_space<vmem>>, vector<1x128xf32>
    %3 = vector.shape_cast %2 : vector<1x128xf32> to vector<1x1x128xf32>
    %4 = vector.broadcast %3 : vector<1x1x128xf32> to vector<1x16x128xf32>
    %5 = arith.mulf %1, %4 : vector<1x16x128xf32>
    %c0_4 = arith.constant 0 : index
    %c0_5 = arith.constant 0 : index
    %6 = vector.load %arg3[%c0_4, %c0_5] : memref<1x128xf32, #tpu.memory_space<vmem>>, vector<1x128xf32>
    %7 = vector.shape_cast %6 : vector<1x128xf32> to vector<1x1x128xf32>
    %8 = vector.broadcast %7 : vector<1x1x128xf32> to vector<1x16x128xf32>
    %9 = arith.addf %5, %8 : vector<1x16x128xf32>
    %cst = arith.constant 0.000000e+00 : f32
    %10 = vector.broadcast %cst : f32 to vector<1x16x128xf32>
    %11 = arith.maximumf %9, %10 : vector<1x16x128xf32>
    %12 = arith.truncf %11 : vector<1x16x128xf32> to vector<1x16x128xbf16>
    %cst_6 = arith.constant 0.000000e+00 : bf16
    %13 = vector.broadcast %cst_6 : bf16 to vector<1x1x128xbf16>
    %14 = tpu.concatenate %13, %12, %13 in 1 : vector<1x1x128xbf16>, vector<1x16x128xbf16>, vector<1x1x128xbf16> -> vector<1x18x128xbf16>
    %cst_7 = arith.constant 0.000000e+00 : f32
    %15 = vector.broadcast %cst_7 : f32 to vector<16x128xf32>
    %16 = vector.extract_strided_slice %14 {offsets = [0, 0, 0], sizes = [1, 16, 128], strides = [1, 1, 1]} : vector<1x18x128xbf16> to vector<1x16x128xbf16>
    %17 = vector.shape_cast %16 : vector<1x16x128xbf16> to vector<16x128xbf16>
    %c0_8 = arith.constant 0 : index
    %c0_9 = arith.constant 0 : index
    %18 = vector.load %arg4[%c0_8, %c0_9] : memref<384x128xbf16, #tpu.memory_space<vmem>>, vector<128x128xbf16>
    %cst_10 = arith.constant dense<0.000000e+00> : vector<16x128xf32>
    %19 = tpu.matmul %17, %18, %cst_10 {dimension_numbers = #tpu.dot_dimension_numbers<[1], [0], [0], [1], [0, 0, 1, 1], [], []>} : vector<16x128xbf16>, vector<128x128xbf16>, vector<16x128xf32> -> vector<16x128xf32>
    %20 = arith.addf %15, %19 : vector<16x128xf32>
    %21 = vector.extract_strided_slice %14 {offsets = [0, 1, 0], sizes = [1, 16, 128], strides = [1, 1, 1]} : vector<1x18x128xbf16> to vector<1x16x128xbf16>
    %22 = vector.shape_cast %21 : vector<1x16x128xbf16> to vector<16x128xbf16>
    %c128 = arith.constant 128 : index
    %c0_11 = arith.constant 0 : index
    %23 = vector.load %arg4[%c128, %c0_11] : memref<384x128xbf16, #tpu.memory_space<vmem>>, vector<128x128xbf16>
    %cst_12 = arith.constant dense<0.000000e+00> : vector<16x128xf32>
    %24 = tpu.matmul %22, %23, %cst_12 {dimension_numbers = #tpu.dot_dimension_numbers<[1], [0], [0], [1], [0, 0, 1, 1], [], []>} : vector<16x128xbf16>, vector<128x128xbf16>, vector<16x128xf32> -> vector<16x128xf32>
    %25 = arith.addf %20, %24 : vector<16x128xf32>
    %26 = vector.extract_strided_slice %14 {offsets = [0, 2, 0], sizes = [1, 16, 128], strides = [1, 1, 1]} : vector<1x18x128xbf16> to vector<1x16x128xbf16>
    %27 = vector.shape_cast %26 : vector<1x16x128xbf16> to vector<16x128xbf16>
    %c256 = arith.constant 256 : index
    %c0_13 = arith.constant 0 : index
    %28 = vector.load %arg4[%c256, %c0_13] : memref<384x128xbf16, #tpu.memory_space<vmem>>, vector<128x128xbf16>
    %cst_14 = arith.constant dense<0.000000e+00> : vector<16x128xf32>
    %29 = tpu.matmul %27, %28, %cst_14 {dimension_numbers = #tpu.dot_dimension_numbers<[1], [0], [0], [1], [0, 0, 1, 1], [], []>} : vector<16x128xbf16>, vector<128x128xbf16>, vector<16x128xf32> -> vector<16x128xf32>
    %30 = arith.addf %25, %29 : vector<16x128xf32>
    %31 = vector.shape_cast %30 : vector<16x128xf32> to vector<1x16x128xf32>
    %c0_15 = arith.constant 0 : index
    %c0_16 = arith.constant 0 : index
    %c0_17 = arith.constant 0 : index
    %32 = vector.load %arg5[%c0_15, %c0_16, %c0_17] : memref<1x16x128xf32, #tpu.memory_space<vmem>>, vector<1x16x128xf32>
    tpu.vector_store %arg5[%c0_15, %c0_16, %c0_17], %31 {strides = array<i32>} : memref<1x16x128xf32, #tpu.memory_space<vmem>>, vector<1x16x128xf32>,
    %cst_18 = arith.constant dense<0.000000e+00> : vector<128xf32>
    %33 = vector.multi_reduction <add>, %30, %cst_18 [0] : vector<16x128xf32> to vector<128xf32>
    %34 = vector.shape_cast %33 : vector<128xf32> to vector<1x128xf32>
    %35 = arith.mulf %30, %30 : vector<16x128xf32>
    %cst_19 = arith.constant dense<0.000000e+00> : vector<128xf32>
    %36 = vector.multi_reduction <add>, %35, %cst_19 [0] : vector<16x128xf32> to vector<128xf32>
    %37 = vector.shape_cast %36 : vector<128xf32> to vector<1x128xf32>
    %38 = tpu.concatenate %34, %37 in 0 : vector<1x128xf32>, vector<1x128xf32> -> vector<2x128xf32>
    %39 = vector.shape_cast %38 : vector<2x128xf32> to vector<1x2x128xf32>
    %c0_20 = arith.constant 0 : index
    %c0_21 = arith.constant 0 : index
    %c0_22 = arith.constant 0 : index
    %40 = vector.load %arg6[%c0_20, %c0_21, %c0_22] : memref<1x2x128xf32, #tpu.memory_space<vmem>>, vector<1x2x128xf32>
    tpu.vector_store %arg6[%c0_20, %c0_21, %c0_22], %39 {strides = array<i32>} : memref<1x2x128xf32, #tpu.memory_space<vmem>>, vector<1x2x128xf32>,
    return
  }
  func.func @transform_0(%arg0: i32) -> (i32, i32, i32) {
    %c0_i32 = arith.constant 0 : i32
    %c0_i32_0 = arith.constant 0 : i32
    %c0_i32_1 = arith.constant 0 : i32
    return %arg0, %c0_i32, %c0_i32_0 : i32, i32, i32
  }
  func.func @transform_1(%arg0: i32) -> (i32, i32) {
    %c0_i32 = arith.constant 0 : i32
    %c0_i32_0 = arith.constant 0 : i32
    %c0_i32_1 = arith.constant 0 : i32
    return %c0_i32, %c0_i32_0 : i32, i32
  }
  func.func @transform_2(%arg0: i32) -> (i32, i32) {
    %c0_i32 = arith.constant 0 : i32
    %c0_i32_0 = arith.constant 0 : i32
    %c0_i32_1 = arith.constant 0 : i32
    return %c0_i32, %c0_i32_0 : i32, i32
  }
  func.func @transform_3(%arg0: i32) -> (i32, i32) {
    %c0_i32 = arith.constant 0 : i32
    %c0_i32_0 = arith.constant 0 : i32
    %c0_i32_1 = arith.constant 0 : i32
    return %c0_i32, %c0_i32_0 : i32, i32
  }
  func.func @transform_4(%arg0: i32) -> (i32, i32, i32) {
    %c0_i32 = arith.constant 0 : i32
    %c0_i32_0 = arith.constant 0 : i32
    %c0_i32_1 = arith.constant 0 : i32
    return %arg0, %c0_i32, %c0_i32_0 : i32, i32, i32
  }
  func.func @transform_5(%arg0: i32) -> (i32, i32, i32) {
    %c0_i32 = arith.constant 0 : i32
    %c0_i32_0 = arith.constant 0 : i32
    %c0_i32_1 = arith.constant 0 : i32
    return %arg0, %c0_i32, %c0_i32_0 : i32, i32, i32
  }
}

module attributes {stable_mosaic.version = 11 : i64} {
  func.func @_bn_add_relu_kernel(%arg0: i32, %arg1: memref<1x16x128xf32, #tpu.memory_space<vmem>>, %arg2: memref<1x128xf32, #tpu.memory_space<vmem>>, %arg3: memref<1x128xf32, #tpu.memory_space<vmem>>, %arg4: memref<1x16x128xf32, #tpu.memory_space<vmem>>, %arg5: memref<1x16x128xf32, #tpu.memory_space<vmem>>) attributes {dimension_semantics = [#tpu.dimension_semantics<parallel>], iteration_bounds = array<i64: 2>, scalar_prefetch = 0 : i64, scratch_operands = 0 : i64, tpu.core_type = #tpu.core_type<tc>, window_params = [{transform_indices = @transform_0, window_bounds = array<i64: 1, 16, 128>}, {pipeline_mode = #tpu.pipeline_mode<synchronous>, transform_indices = @transform_1, window_bounds = array<i64: 1, 128>}, {pipeline_mode = #tpu.pipeline_mode<synchronous>, transform_indices = @transform_2, window_bounds = array<i64: 1, 128>}, {transform_indices = @transform_3, window_bounds = array<i64: 1, 16, 128>}, {transform_indices = @transform_4, window_bounds = array<i64: 1, 16, 128>}]} {
    %c0 = arith.constant 0 : index
    %c0_0 = arith.constant 0 : index
    %c0_1 = arith.constant 0 : index
    %0 = vector.load %arg1[%c0, %c0_0, %c0_1] : memref<1x16x128xf32, #tpu.memory_space<vmem>>, vector<1x16x128xf32>
    %c0_2 = arith.constant 0 : index
    %c0_3 = arith.constant 0 : index
    %1 = vector.load %arg2[%c0_2, %c0_3] : memref<1x128xf32, #tpu.memory_space<vmem>>, vector<1x128xf32>
    %2 = vector.shape_cast %1 : vector<1x128xf32> to vector<1x1x128xf32>
    %3 = vector.broadcast %2 : vector<1x1x128xf32> to vector<1x16x128xf32>
    %4 = arith.mulf %0, %3 : vector<1x16x128xf32>
    %c0_4 = arith.constant 0 : index
    %c0_5 = arith.constant 0 : index
    %5 = vector.load %arg3[%c0_4, %c0_5] : memref<1x128xf32, #tpu.memory_space<vmem>>, vector<1x128xf32>
    %6 = vector.shape_cast %5 : vector<1x128xf32> to vector<1x1x128xf32>
    %7 = vector.broadcast %6 : vector<1x1x128xf32> to vector<1x16x128xf32>
    %8 = arith.addf %4, %7 : vector<1x16x128xf32>
    %c0_6 = arith.constant 0 : index
    %c0_7 = arith.constant 0 : index
    %c0_8 = arith.constant 0 : index
    %9 = vector.load %arg4[%c0_6, %c0_7, %c0_8] : memref<1x16x128xf32, #tpu.memory_space<vmem>>, vector<1x16x128xf32>
    %10 = arith.addf %8, %9 : vector<1x16x128xf32>
    %cst = arith.constant 0.000000e+00 : f32
    %11 = vector.broadcast %cst : f32 to vector<1x16x128xf32>
    %12 = arith.maximumf %10, %11 : vector<1x16x128xf32>
    %c0_9 = arith.constant 0 : index
    %c0_10 = arith.constant 0 : index
    %c0_11 = arith.constant 0 : index
    %13 = vector.load %arg5[%c0_9, %c0_10, %c0_11] : memref<1x16x128xf32, #tpu.memory_space<vmem>>, vector<1x16x128xf32>
    tpu.vector_store %arg5[%c0_9, %c0_10, %c0_11], %12 {strides = array<i32>} : memref<1x16x128xf32, #tpu.memory_space<vmem>>, vector<1x16x128xf32>,
    return
  }
  func.func @transform_0(%arg0: i32) -> (i32, i32, i32) {
    %c0_i32 = arith.constant 0 : i32
    %c0_i32_0 = arith.constant 0 : i32
    %c0_i32_1 = arith.constant 0 : i32
    return %arg0, %c0_i32, %c0_i32_0 : i32, i32, i32
  }
  func.func @transform_1(%arg0: i32) -> (i32, i32) {
    %c0_i32 = arith.constant 0 : i32
    %c0_i32_0 = arith.constant 0 : i32
    %c0_i32_1 = arith.constant 0 : i32
    return %c0_i32, %c0_i32_0 : i32, i32
  }
  func.func @transform_2(%arg0: i32) -> (i32, i32) {
    %c0_i32 = arith.constant 0 : i32
    %c0_i32_0 = arith.constant 0 : i32
    %c0_i32_1 = arith.constant 0 : i32
    return %c0_i32, %c0_i32_0 : i32, i32
  }
  func.func @transform_3(%arg0: i32) -> (i32, i32, i32) {
    %c0_i32 = arith.constant 0 : i32
    %c0_i32_0 = arith.constant 0 : i32
    %c0_i32_1 = arith.constant 0 : i32
    return %arg0, %c0_i32, %c0_i32_0 : i32, i32, i32
  }
  func.func @transform_4(%arg0: i32) -> (i32, i32, i32) {
    %c0_i32 = arith.constant 0 : i32
    %c0_i32_0 = arith.constant 0 : i32
    %c0_i32_1 = arith.constant 0 : i32
    return %arg0, %c0_i32, %c0_i32_0 : i32, i32, i32
  }
}

</mosaic_0001>

<bundles_post_ra>
// kernel: tile.23
= control target key start
LH: loop header
LB: loop body
LE: loop exit
PB: predicated region body
PF: predicated region fallthrough
CT: control target
= control target key end

     0   :  { %s28_s0 = inlined_call_operand.vmem [shape: f32[8], index: 0, kind: input, shape index: {}]   ;;  %s29_s1 = inlined_call_operand.vmem [shape: f32[16,8], index: 1, kind: output, shape index: {}]  }
   0x1   :  { %v4_v0 = vld [vmem:[%s28_s0] ss:$0 sm:$0xff] }
   0x2   :  { %5 = vst [vmem:[%s29_s1] sm:$0xff] %v4_v0  ;;  %8 = vst [vmem:[%s29_s1 + $0x8] sm:$0xff] %v4_v0 }

// kernel: tile.24
= control target key start
LH: loop header
LB: loop body
LE: loop exit
PB: predicated region body
PF: predicated region fallthrough
CT: control target
= control target key end

     0   :  { %s131_s10 = smov 120   ;;  %s132_s11 = smov 104   ;;  %vm3_vm0 = vcmask 64512   ;;  %vm9_vm1 = vcmask 1048512   ;;  %vm15_vm2 = vcmask 982912   ;;  %vm21_vm3 = vcmask 917312   ;;  %s207_s0 = inlined_call_operand.vmem [shape: f32[16,8], index: 0, kind: input, shape index: {}]   ;;  %s208_s1 = inlined_call_operand.vmem [shape: f32[1,128], index: 1, kind: output, shape index: {}]  }
   0x1   :  { %v101_v0 = vld [vmem:[%s207_s0 + $0xf] sm:$0x1]   ;;  %v103_v1 = vld [vmem:[%s207_s0 + $0xd] sm:$0x1]   ;;  %v102_v2 = vld [vmem:[%s207_s0 + $0xe] sm:$0x1]  }
   0x2   :  { %7 = vrot.lane.b32.xlu0 %v101_v0, %s131_s10  ;;  %19 = vrot.lane.b32.xlu1 %v103_v1, %s132_s11  ;;  %v104_v3 = vld [vmem:[%s207_s0 + $0xc] sm:$0x1]   ;;  %s133_s16 = smov 112   ;;  %s134_s17 = smov 96   ;;  %v105_v4 = vld [vmem:[%s207_s0 + $0xb] sm:$0x1]  }
   0x3   :  { %v106_v5 = vld [vmem:[%s207_s0 + $0xa] sm:$0x1]   ;;  %v2_v6 = vld [vmem:[%s207_s0] sm:$0x1]   ;;  %s135_s24 = smov 88   ;;  %s136_s25 = smov 80  }
   0x4   :  { %4 = vst.msk [vmem:[#allocation0] sm:$0x1] %vm3_vm0, %v2_v6   ;;  %v107_v7 = vld [vmem:[%s207_s0 + $0x9] sm:$0x1]   ;;  %v108_v8 = vld [vmem:[%s207_s0 + $0x8] sm:$0x1]  }
   0x5   :  { %s137_s30 = smov 72   ;;  %s138_s2 = smov 64   ;;  %v109_v9 = vld [vmem:[%s207_s0 + $0x7] sm:$0x1]   ;;  %v110_v10 = vld [vmem:[%s207_s0 + $0x6] sm:$0x1]  }
   0x6   :  { %13 = vrot.lane.b32.xlu0 %v102_v2, %s133_s16  ;;  %25 = vrot.lane.b32.xlu1 %v104_v3, %s134_s17  ;;  %s139_s7 = smov 56   ;;  %s140_s8 = smov 48   ;;  %v111_v11 = vld [vmem:[%s207_s0 + $0x5] sm:$0x1]   ;;  %v112_v12 = vld [vmem:[%s207_s0 + $0x4] sm:$0x1]  }
   0x7   :  { %s141_s13 = smov 40   ;;  %s142_s14 = smov 32   ;;  %v113_v13 = vld [vmem:[%s207_s0 + $0x3] sm:$0x1]   ;;  %v114_v14 = vld [vmem:[%s207_s0 + $0x2] sm:$0x1]  }
   0x8   :  { %s143_s19 = smov 24   ;;  %s144_s20 = smov 16   ;;  %v115_v15 = vld [vmem:[%s207_s0 + $0x1] sm:$0x1]   ;;  %vm27_vm4 = vcmask 851712   ;;  %vm33_vm5 = vcmask 786112  }
   0x9   :  { %s145_s0 = smov 8   ;;  %vm39_vm6 = vcmask 720512   ;;  %vm45_vm7 = vcmask 654912   ;;  %vm51_vm8 = vcmask 589312   ;;  %vm57_vm9 = vcmask 523712  }
   0xa   :  { %31 = vrot.lane.b32.xlu0 %v105_v4, %s135_s24  ;;  %37 = vrot.lane.b32.xlu1 %v106_v5, %s136_s25  ;;  %vm63_vm10 = vcmask 458112   ;;  %vm69_vm11 = vcmask 392512   ;;  %vm75_vm12 = vcmask 326912   ;;  %vm81_vm13 = vcmask 261312  }
   0xb   :  { %vm87_vm14 = vcmask 195712   ;;  %vm93_vm15 = vcmask 130112  }
   0xe   :  { %43 = vrot.lane.b32.xlu0 %v107_v7, %s137_s30  ;;  %49 = vrot.lane.b32.xlu1 %v108_v8, %s138_s2 }
  0x12   :  { %55 = vrot.lane.b32.xlu0 %v109_v9, %s139_s7  ;;  %61 = vrot.lane.b32.xlu1 %v110_v10, %s140_s8 }
  0x16   :  { %67 = vrot.lane.b32.xlu0 %v111_v11, %s141_s13  ;;  %73 = vrot.lane.b32.xlu1 %v112_v12, %s142_s14 }
  0x1a   :  { %79 = vrot.lane.b32.xlu0 %v113_v13, %s143_s19  ;;  %85 = vrot.lane.b32.xlu1 %v114_v14, %s144_s20 }
  0x1e   :  { %91 = vrot.lane.b32.xlu0 %v115_v15, %s145_s0 }
  0x74   :  { %v8_v16 = vpop.permute.xlu0 %7   ;;  %v20_v17 = vpop.permute.xlu1 %19  }
  0x75   :  { %10 = vst.msk [vmem:[#allocation0] sm:$0x1] %vm9_vm1, %v8_v16  }
  0x78   :  { %v14_v18 = vpop.permute.xlu0 %13   ;;  %v26_v19 = vpop.permute.xlu1 %25  }
  0x79   :  { %16 = vst.msk [vmem:[#allocation0] sm:$0x1] %vm15_vm2, %v14_v18  }
  0x7a   :  { %22 = vst.msk [vmem:[#allocation0] sm:$0x1] %vm21_vm3, %v20_v17  }
  0x7b   :  { %28 = vst.msk [vmem:[#allocation0] sm:$0x1] %vm27_vm4, %v26_v19  }
  0x7c   :  { %v32_v20 = vpop.permute.xlu0 %31   ;;  %v38_v21 = vpop.permute.xlu1 %37  }
  0x7d   :  { %34 = vst.msk [vmem:[#allocation0] sm:$0x1] %vm33_vm5, %v32_v20  }
  0x7e   :  { %40 = vst.msk [vmem:[#allocation0] sm:$0x1] %vm39_vm6, %v38_v21  }
  0x80   :  { %v44_v22 = vpop.permute.xlu0 %43   ;;  %v50_v23 = vpop.permute.xlu1 %49  }
  0x81   :  { %46 = vst.msk [vmem:[#allocation0] sm:$0x1] %vm45_vm7, %v44_v22  }
  0x82   :  { %52 = vst.msk [vmem:[#allocation0] sm:$0x1] %vm51_vm8, %v50_v23  }
  0x84   :  { %v56_v24 = vpop.permute.xlu0 %55   ;;  %v62_v25 = vpop.permute.xlu1 %61  }
  0x85   :  { %58 = vst.msk [vmem:[#allocation0] sm:$0x1] %vm57_vm9, %v56_v24  }
  0x86   :  { %64 = vst.msk [vmem:[#allocation0] sm:$0x1] %vm63_vm10, %v62_v25  }
  0x88   :  { %v68_v26 = vpop.permute.xlu0 %67   ;;  %v74_v27 = vpop.permute.xlu1 %73  }
  0x89   :  { %70 = vst.msk [vmem:[#allocation0] sm:$0x1] %vm69_vm11, %v68_v26  }
  0x8a   :  { %76 = vst.msk [vmem:[#allocation0] sm:$0x1] %vm75_vm12, %v74_v27  }
  0x8c   :  { %v80_v28 = vpop.permute.xlu0 %79   ;;  %v86_v29 = vpop.permute.xlu1 %85  }
  0x8d   :  { %82 = vst.msk [vmem:[#allocation0] sm:$0x1] %vm81_vm13, %v80_v28  }
  0x8e   :  { %88 = vst.msk [vmem:[#allocation0] sm:$0x1] %vm87_vm14, %v86_v29  }
  0x90   :  { %v92_v30 = vpop.permute.xlu0 %91  }
  0x91   :  { %94 = vst.msk [vmem:[#allocation0] sm:$0x1] %vm93_vm15, %v92_v30  }
  0x98   :  { %v98_v31 = vld [vmem:[#allocation0] sm:$0x1] }
  0x99   :  { %100 = vst [vmem:[%s208_s1] sm:$0x1] %v98_v31 }

// kernel: basic_block_forward.3
= control target key start
LH: loop header
LB: loop body
LE: loop exit
PB: predicated region body
PF: predicated region fallthrough
CT: control target
= control target key end

     0   :  { %s863_s12 = smov 0   ;;  %s995_s0 = inlined_call_operand.vmem [shape: bf16[2,16,128], index: 0, kind: input, shape index: {}]   ;;  %s996_s1 = inlined_call_operand.vmem [shape: bf16[384,128], index: 1, kind: input, shape index: {}]   ;;  %s997_s2 = inlined_call_operand.vmem [shape: bf16[2,16,128], index: 2, kind: output, shape index: {0}]   ;;  %s998_s3 = inlined_call_operand.vmem [shape: f32[2,2,128], index: 3, kind: output, shape index: {1}]  }
   0x1 LB: > { %s657_s13 = sadd.s32 4294967295, %s839_s12   ;;  %p661_p0 = scmp.ge.s32.totalorder %s839_s12, 1  ;;  %s839_s12 = sphi %s863_s12, %s14_s12  }
   0x2   : > { %p140_p1 = scmp.lt.s32.totalorder %s839_s12, 3 }
   0x4   : > { %p141_p2 = pnand %p661_p0, %p140_p1 }
   0x5   : > { %v808_v0 = vld [vmem:[%s996_s1] sm:$0xff] (!%p141_p2)   ;;  %v841_v1 = vmov (!%p141_p2), 0.0   ;;  %v809_v2 = vld [vmem:[%s996_s1 + $0x8] sm:$0xff] (!%p141_p2)   ;;  %vm842_vm0 = vmmov (!%p141_p2), 0   ;;  %p168_p3 = scmp.lt.s32.totalorder (!%p141_p2), %s657_s13, 1  ;;  %v810_v3 = vld [vmem:[%s996_s1 + $0x10] sm:$0xff] (!%p141_p2)  }
   0x6   : > { %144 = sbr.rel (%p141_p2) target bundleno = 304 (0x130), region = 28  ;;  %752 = vmatprep.subr.bf16.mxu0 (!%p141_p2), %v841_v1  ;;  %732 = vmatprep.subr.bf16.mxu1 (!%p141_p2), %v841_v1  ;;  %v816_v4 = vld [vmem:[%s996_s1 + $0x40] sm:$0xff] (!%p141_p2)   ;;  %v811_v6 = vld [vmem:[%s996_s1 + $0x18] sm:$0xff] (!%p141_p2)   ;;  %v819_v7 = vld [vmem:[%s996_s1 + $0x48] sm:$0xff] (!%p141_p2)   ;;  %vm199_vm1 = vcmask (!%p141_p2), 1040384   ;;  %vm446_vm5 = vcmask (!%p141_p2), 1046528  }
   0x7   : > { %753 = vmatpush3.bf16.msra.mxu0 (!%p141_p2), %v808_v0  ;;  %768 = vmatprep.mubr.msk.bf16.mxu0 (!%p141_p2), %vm842_vm0, %v841_v1  ;;  %v812_v8 = vld [vmem:[%s996_s1 + $0x20] sm:$0xff] (!%p141_p2)   ;;  %v821_v10 = vld [vmem:[%s996_s1 + $0x50] sm:$0xff] (!%p141_p2)   ;;  %v813_v13 = vld [vmem:[%s996_s1 + $0x28] sm:$0xff] (!%p141_p2)   ;;  %vm200_vm2 = vsmask.f32 (!%p141_p2), 256 }
   0x8   : > { %754 = vmatprep.subr.bf16.mxu0 (!%p141_p2), %v841_v1  ;;  %748 = vmatprep.mubr.msk.bf16.mxu1 (!%p141_p2), %vm842_vm0, %v841_v1  ;;  %v823_v14 = vld [vmem:[%s996_s1 + $0x58] sm:$0xff] (!%p141_p2)   ;;  %v814_v15 = vld [vmem:[%s996_s1 + $0x30] sm:$0xff] (!%p141_p2)   ;;  %vm201_vm3 = vmand (!%p141_p2), %vm199_vm1, %vm200_vm2  ;;  %vm236_vm4 = vsmask.f32 (!%p141_p2), 7424 }
   0x9   : > { %733 = vmatpush3.bf16.msra.mxu1 (!%p141_p2), %v816_v4  ;;  %v825_v17 = vld [vmem:[%s996_s1 + $0x60] sm:$0xff] (!%p141_p2)   ;;  %v815_v19 = vld [vmem:[%s996_s1 + $0x38] sm:$0xff] (!%p141_p2)   ;;  %v827_v21 = vld [vmem:[%s996_s1 + $0x68] sm:$0xff] (!%p141_p2)  }
   0xa   : > { %734 = vmatprep.subr.bf16.mxu1 (!%p141_p2), %v841_v1  ;;  %v818_v26 = vld [vmem:[%s996_s1 + $0x80] sm:$0xff] (!%p141_p2)   ;;  %v829_v27 = vld [vmem:[%s996_s1 + $0x70] sm:$0xff] (!%p141_p2)   ;;  %v820_v28 = vld [vmem:[%s996_s1 + $0x88] sm:$0xff] (!%p141_p2)  }
   0xb   : > { %755 = vmatpush3.bf16.msra.mxu0 (!%p141_p2), %v809_v2  ;;  %v831_v29 = vld [vmem:[%s996_s1 + $0x78] sm:$0xff] (!%p141_p2)   ;;  %v822_v32 = vld [vmem:[%s996_s1 + $0x90] sm:$0xff] (!%p141_p2)   ;;  %v826_v35 = vld [vmem:[%s996_s1 + $0xa0] sm:$0xff] (!%p141_p2)  }
   0xc   : > { %756 = vmatprep.subr.bf16.mxu0 (!%p141_p2), %v841_v1  ;;  %v824_v34 = vld [vmem:[%s996_s1 + $0x98] sm:$0xff] (!%p141_p2)   ;;  %v828_v36 = vld [vmem:[%s996_s1 + $0xa8] sm:$0xff] (!%p141_p2)   ;;  %v830_v37 = vld [vmem:[%s996_s1 + $0xb0] sm:$0xff] (!%p141_p2)  }
   0xd   : > { %s1000_s13 = smov (!%p168_p3, %s657_s13), 1  ;;  %735 = vmatpush3.bf16.msra.mxu1 %v819_v7  ;;  %v832_v40 = vld [vmem:[%s996_s1 + $0xb8] sm:$0xff]  }
   0xe   : > { %s696_s20 = sshll.u32 %s1000_s13, 3  ;;  %736 = vmatprep.subr.bf16.mxu1 %v841_v1  ;;  %s666_s21 = sshll.u32 %s1000_s13, 1 }
   0xf   : > { %s172_s23 = scalar_lea.vmem %s995_s0, %s696_s20  ;;  %757 = vmatpush3.bf16.msra.mxu0 %v810_v3  ;;  %s177_s19 = scalar_lea.vmem %s997_s2, %s696_s20 }
  0x10   : > { %v817_v5 = vld [vmem:[%s172_s23] sm:$0xff]   ;;  %758 = vmatprep.subr.bf16.mxu0 %v841_v1  ;;  %s181_s23 = scalar_lea.vmem %s998_s3, %s666_s21 }
  0x11   : > { %v191_v9 = vshrl.u32 %v817_v5, 16  ;;  %v194_v12 = vshll.u32 %v817_v5, 16  ;;  %737 = vmatpush3.bf16.msra.mxu1 %v821_v10 }
  0x12   : > { %738 = vmatprep.subr.bf16.mxu1 %v841_v1 }
  0x13   : > { %759 = vmatpush3.bf16.msra.mxu0 %v811_v6  ;;  %v193_v11 = vrot.slane %v191_v9, 7 }
  0x14   : > { %760 = vmatprep.subr.bf16.mxu0 %v841_v1 }
  0x15   : > { %v196_v16 = vor.u32 %v194_v12, %v193_v11  ;;  %739 = vmatpush3.bf16.msra.mxu1 %v823_v14  ;;  %v203_v22 = vsel %vm201_vm3, %v193_v11, 0 }
  0x16   : > { %740 = vmatprep.subr.bf16.mxu1 %v841_v1  ;;  %v245_v25 = vshll.u32 %v203_v22, 16  ;;  %v448_v39 = vrot.slane %v203_v22, 1 }
  0x17   : > { %761 = vmatpush3.bf16.msra.mxu0 %v812_v8  ;;  %v202_v18 = vsel %vm201_vm3, 0, %v196_v16 }
  0x18   : > { %762 = vmatprep.subr.bf16.mxu0 %v841_v1  ;;  %v240_v20 = vshll.u32 %v202_v18, 16  ;;  %v238_v23 = vshrl.u32 %v202_v18, 16  ;;  %v247_v31 = vrot.slane %v245_v25, 1  ;;  %v447_v38 = vrot.slane %v202_v18, 1 }
  0x19   : > { %741 = vmatpush3.bf16.msra.mxu1 %v825_v17 }
  0x1a   : > { %742 = vmatprep.subr.bf16.mxu1 %v841_v1  ;;  %v242_v24 = vrot.slane %v240_v20, 1  ;;  %v449_v41 = vsel %vm446_vm5, %v447_v38, %v448_v39 }
  0x1b   : > { %763 = vmatpush3.bf16.msra.mxu0 %v813_v13 }
  0x1c   : > { %764 = vmatprep.subr.bf16.mxu0 %v841_v1  ;;  %v243_v30 = vor.u32 %v242_v24, %v238_v23 }
  0x1d   : > { %743 = vmatpush3.bf16.msra.mxu1 %v827_v21 }
  0x1e   : > { %744 = vmatprep.subr.bf16.mxu1 %v841_v1  ;;  %v248_v33 = vsel %vm236_vm4, %v243_v30, %v247_v31 }
  0x1f   : > { %765 = vmatpush3.bf16.msra.mxu0 %v814_v15 }
  0x20   : > { %766 = vmatprep.subr.bf16.mxu0 %v841_v1 }
  0x21   : > { %745 = vmatpush3.bf16.msra.mxu1 %v829_v27 }
  0x22   : > { %746 = vmatprep.subr.bf16.mxu1 %v841_v1 }
  0x23   : > { %767 = vmatpush3.bf16.msra.mxu0 %v815_v19 }
  0x24   : > { %772 = vmatprep.subr.bf16.mxu0 %v841_v1 }
  0x25   : > { %747 = vmatpush3.bf16.msra.mxu1 %v831_v29 }
  0x26   : > { %769 = vmatmul.mubr.bf16.vlgmr.msra.gmra.mrb[0].mxu0 %v202_v18 }
  0x27   : > { %773 = vmatpush3.bf16.msra.mxu0 %v818_v26  ;;  %788 = vmatprep.mubr.msk.bf16.mxu0 %vm842_vm0, %v841_v1 }
  0x28   : > { %774 = vmatprep.subr.bf16.mxu0 %v841_v1  ;;  %749 = vmatmul.mubr.bf16.vlgmr.msra.gmra.mrb[0].mxu1 %v248_v33 }
  0x2b   : > { %775 = vmatpush3.bf16.msra.mxu0 %v820_v28 }
  0x2c   : > { %776 = vmatprep.subr.bf16.mxu0 %v841_v1 }
  0x2f   : > { %777 = vmatpush3.bf16.msra.mxu0 %v822_v32 }
  0x30   : > { %778 = vmatprep.subr.bf16.mxu0 %v841_v1 }
  0x33   : > { %779 = vmatpush3.bf16.msra.mxu0 %v824_v34 }
  0x34   : > { %780 = vmatprep.subr.bf16.mxu0 %v841_v1 }
  0x37   : > { %781 = vmatpush3.bf16.msra.mxu0 %v826_v35 }
  0x38   : > { %782 = vmatprep.subr.bf16.mxu0 %v841_v1 }
  0x3b   : > { %783 = vmatpush3.bf16.msra.mxu0 %v828_v36 }
  0x3c   : > { %784 = vmatprep.subr.bf16.mxu0 %v841_v1 }
  0x3f   : > { %785 = vmatpush3.bf16.msra.mxu0 %v830_v37 }
  0x40   : > { %786 = vmatprep.subr.bf16.mxu0 %v841_v1 }
  0x43   : > { %787 = vmatpush3.bf16.msra.mxu0 %v832_v40 }
  0x46   : > { %789 = vmatmul.mubr.bf16.vlgmr.msra.gmra.mrb[0].mxu0 %v449_v41 }
  0xfb   : > { %v332_v42 = vpop.f32.mrb[0].mxu1 }
  0xfc   : > { %v750_v43 = vpop.f32.mrb[1].mxu1 }
  0xfd   : > { %v335_v44 = vpop.f32.mrb[2].mxu1 }
  0xfe   : > { %v751_v45 = vpop.f32.mrb[3].mxu1 }
 0x119   : > { %v533_v46 = vpop.f32.mrb[0].mxu0 }
 0x11a   : > { %v792_v47 = vadd.f32 %v533_v46, %v332_v42  ;;  %v790_v48 = vpop.f32.mrb[1].mxu0 }
 0x11b   : > { %v536_v49 = vpop.f32.mrb[2].mxu0 }
 0x11c   : > { %v793_v50 = vadd.f32 %v536_v49, %v335_v44  ;;  %v791_v51 = vpop.f32.mrb[3].mxu0  ;;  %v559_v52 = vmul.f32 %v792_v47, %v792_v47 }
 0x11e   : > { %v703_v53 = vpack.c.bf16 %v793_v50, %v792_v47  ;;  %v552_v54 = vadd.f32 %v793_v50, %v792_v47  ;;  %v560_v55 = vmul.f32 %v793_v50, %v793_v50 }
 0x120   : > { %704 = vst [vmem:[%s177_s19] sm:$0xff] %v703_v53   ;;  %v553_v56 = vrot.slane %v552_v54, 4  ;;  %v561_v57 = vadd.f32 %v560_v55, %v559_v52 }
 0x122   : > { %v554_v58 = vadd.f32 %v553_v56, %v552_v54  ;;  %v562_v59 = vrot.slane %v561_v57, 4 }
 0x124   : > { %v555_v60 = vrot.slane %v554_v58, 2  ;;  %v563_v61 = vadd.f32 %v562_v59, %v561_v57 }
 0x126   : > { %v556_v62 = vadd.f32 %v555_v60, %v554_v58  ;;  %v564_v63 = vrot.slane %v563_v61, 2 }
 0x128   : > { %v557_v0 = vrot.slane %v556_v62, 1  ;;  %v565_v1 = vadd.f32 %v564_v63, %v563_v61 }
 0x12a   : > { %v566_v2 = vrot.slane %v565_v1, 1  ;;  %v558_v3 = vadd.f32 %v557_v0, %v556_v62 }
 0x12c   : > { %v567_v4 = vadd.f32 %v566_v2, %v565_v1 }
 0x12e   : > { %v569_v5 = vsel %vm199_vm1, %v558_v3, %v567_v4 }
 0x12f   : > { %570 = vst [vmem:[%s181_s23] sm:$0x3] %v569_v5 }
 0x130 PF: > { %s14_s12 = sadd.s32 1, %s839_s12  }
 0x131   : > { %p11_p4 = scmp.ge.s32.totalorder %s14_s12, 4  }
 0x133   :  { %13 = sbr.rel (!%p11_p4) target bundleno = 1 (0x1), region = 70 }

// kernel: basic_block_forward.5
= control target key start
LH: loop header
LB: loop body
LE: loop exit
PB: predicated region body
PF: predicated region fallthrough
CT: control target
= control target key end

     0   :  { %s372_s15 = smov 0   ;;  %s398_s0 = inlined_call_operand.vmem [shape: f32[2,16,128], index: 0, kind: input, shape index: {}, may-alias: {0,4}]   ;;  %s399_s1 = inlined_call_operand.vmem [shape: f32[1,128], index: 1, kind: input, shape index: {}]   ;;  %s400_s2 = inlined_call_operand.vmem [shape: f32[1,128], index: 2, kind: input, shape index: {}]   ;;  %s401_s3 = inlined_call_operand.vmem [shape: f32[2,16,128], index: 3, kind: input, shape index: {}]   ;;  %s402_s4 = inlined_call_operand.vmem [shape: f32[2,16,128], index: 4, kind: output, shape index: {}, may-alias: {0,4}]  }
   0x1 LB: > { %s313_s16 = sadd.s32 4294967295, %s345_s15   ;;  %p317_p0 = scmp.ge.s32.totalorder %s345_s15, 1  ;;  %s345_s15 = sphi %s372_s15, %s14_s15  }
   0x2   : > { %p172_p1 = scmp.lt.s32.totalorder %s345_s15, 3 }
   0x4   : > { %p173_p2 = pnand %p317_p0, %p172_p1 }
   0x5   : > { %p203_p3 = scmp.lt.s32.totalorder (!%p173_p2), %s313_s16, 1  ;;  %v324_v0 = vld [vmem:[%s399_s1] ss:$0 sm:$0xff] (!%p173_p2) }
   0x6   : > { %176 = sbr.rel (%p173_p2) target bundleno = 26 (0x1a), region = 36  ;;  %v325_v3 = vld [vmem:[%s400_s2] ss:$0 sm:$0xff] (!%p173_p2) }
   0xd   : > { %s404_s16 = smov (!%p203_p3, %s313_s16), 1 }
   0xe   : > { %s328_s17 = sshll.u32 %s404_s16, 4 }
   0xf   : > { %s207_s22 = scalar_lea.vmem %s398_s0, %s328_s17  ;;  %s212_s25 = scalar_lea.vmem %s401_s3, %s328_s17 }
  0x10   : > { %v218_v1 = vld [vmem:[%s207_s22] sm:$0xff]  ;;  %v219_v2 = vld [vmem:[%s207_s22 + $0x8] sm:$0xff]  ;;  %s217_s30 = scalar_lea.vmem %s402_s4, %s328_s17 }
  0x11   : > { %v227_v4 = vmul.f32 %v324_v0, %v218_v1  ;;  %v228_v5 = vmul.f32 %v324_v0, %v219_v2  ;;  %v238_v6 = vld [vmem:[%s212_s25] sm:$0xff]  ;;  %v239_v7 = vld [vmem:[%s212_s25 + $0x8] sm:$0xff] }
  0x13   : > { %v236_v8 = vadd.f32 %v325_v3, %v227_v4  ;;  %v237_v9 = vadd.f32 %v325_v3, %v228_v5 }
  0x15   : > { %v240_v10 = vadd.f32 %v238_v6, %v236_v8  ;;  %v241_v11 = vadd.f32 %v239_v7, %v237_v9 }
  0x17   : > { %v242_v12 = vmax.f32 %v240_v10, 0.0  ;;  %v243_v13 = vmax.f32 %v241_v11, 0.0 }
  0x19   : > { %244 = vst [vmem:[%s217_s30] sm:$0xff] %v242_v12  ;;  %245 = vst [vmem:[%s217_s30 + $0x8] sm:$0xff] %v243_v13 }
  0x1a PF: > { %s14_s15 = sadd.s32 1, %s345_s15  }
  0x1b   : > { %p11_p4 = scmp.ge.s32.totalorder %s14_s15, 4  }
  0x1d   :  { %13 = sbr.rel (!%p11_p4) target bundleno = 1 (0x1), region = 69 }

// kernel: basic_block_forward.4
= control target key start
LH: loop header
LB: loop body
LE: loop exit
PB: predicated region body
PF: predicated region fallthrough
CT: control target
= control target key end

     0   :  { %s932_s18 = smov 0   ;;  %s1067_s0 = inlined_call_operand.vmem [shape: bf16[2,16,128], index: 0, kind: input, shape index: {}]   ;;  %s1068_s1 = inlined_call_operand.vmem [shape: f32[1,128], index: 1, kind: input, shape index: {}]   ;;  %s1069_s2 = inlined_call_operand.vmem [shape: f32[1,128], index: 2, kind: input, shape index: {}]   ;;  %s1070_s3 = inlined_call_operand.vmem [shape: bf16[384,128], index: 3, kind: input, shape index: {}]   ;;  %s1071_s4 = inlined_call_operand.vmem [shape: f32[2,16,128], index: 4, kind: output, shape index: {0}]   ;;  %s1072_s5 = inlined_call_operand.vmem [shape: f32[2,2,128], index: 5, kind: output, shape index: {1}]  }
   0x1 LB: > { %s721_s19 = sadd.s32 4294967295, %s898_s18   ;;  %p725_p0 = scmp.ge.s32.totalorder %s898_s18, 1  ;;  %s898_s18 = sphi %s932_s18, %s16_s18  }
   0x2   : > { %p190_p1 = scmp.lt.s32.totalorder %s898_s18, 3 }
   0x4   : > { %p191_p2 = pnand %p725_p0, %p190_p1 }
   0x5   : > { %v868_v0 = vld [vmem:[%s1070_s3] sm:$0xff] (!%p191_p2)   ;;  %v900_v1 = vmov (!%p191_p2), 0.0   ;;  %v869_v2 = vld [vmem:[%s1070_s3 + $0x8] sm:$0xff] (!%p191_p2)   ;;  %vm901_vm0 = vmmov (!%p191_p2), 0   ;;  %p222_p3 = scmp.lt.s32.totalorder (!%p191_p2), %s721_s19, 1  ;;  %v870_v3 = vld [vmem:[%s1070_s3 + $0x10] sm:$0xff] (!%p191_p2)  }
   0x6   : > { %194 = sbr.rel (%p191_p2) target bundleno = 304 (0x130), region = 36  ;;  %812 = vmatprep.subr.bf16.mxu0 (!%p191_p2), %v900_v1  ;;  %792 = vmatprep.subr.bf16.mxu1 (!%p191_p2), %v900_v1  ;;  %v876_v4 = vld [vmem:[%s1070_s3 + $0x40] sm:$0xff] (!%p191_p2)   ;;  %v871_v7 = vld [vmem:[%s1070_s3 + $0x18] sm:$0xff] (!%p191_p2)   ;;  %v878_v13 = vld [vmem:[%s1070_s3 + $0x48] sm:$0xff] (!%p191_p2)   ;;  %vm271_vm1 = vcmask (!%p191_p2), 1040384   ;;  %vm518_vm5 = vcmask (!%p191_p2), 1046528  }
   0x7   : > { %813 = vmatpush3.bf16.msra.mxu0 (!%p191_p2), %v868_v0  ;;  %828 = vmatprep.mubr.msk.bf16.mxu0 (!%p191_p2), %vm901_vm0, %v900_v1  ;;  %v731_v6 = vld [vmem:[%s1068_s1] ss:$0 sm:$0xff] (!%p191_p2)  ;;  %v880_v17 = vld [vmem:[%s1070_s3 + $0x50] sm:$0xff] (!%p191_p2)   ;;  %v873_v18 = vld [vmem:[%s1070_s3 + $0x28] sm:$0xff] (!%p191_p2)   ;;  %vm272_vm2 = vsmask.f32 (!%p191_p2), 256 }
   0x8   : > { %814 = vmatprep.subr.bf16.mxu0 (!%p191_p2), %v900_v1  ;;  %808 = vmatprep.mubr.msk.bf16.mxu1 (!%p191_p2), %vm901_vm0, %v900_v1  ;;  %v732_v10 = vld [vmem:[%s1069_s2] ss:$0 sm:$0xff] (!%p191_p2)  ;;  %v882_v22 = vld [vmem:[%s1070_s3 + $0x58] sm:$0xff] (!%p191_p2)   ;;  %v874_v23 = vld [vmem:[%s1070_s3 + $0x30] sm:$0xff] (!%p191_p2)   ;;  %vm308_vm4 = vsmask.f32 (!%p191_p2), 7424 }
   0x9   : > { %793 = vmatpush3.bf16.msra.mxu1 (!%p191_p2), %v876_v4  ;;  %v872_v14 = vld [vmem:[%s1070_s3 + $0x20] sm:$0xff] (!%p191_p2)   ;;  %vm273_vm3 = vmand (!%p191_p2), %vm271_vm1, %vm272_vm2  ;;  %v875_v29 = vld [vmem:[%s1070_s3 + $0x38] sm:$0xff] (!%p191_p2)  }
   0xa   : > { %794 = vmatprep.subr.bf16.mxu1 (!%p191_p2), %v900_v1  ;;  %v884_v27 = vld [vmem:[%s1070_s3 + $0x60] sm:$0xff] (!%p191_p2)   ;;  %v886_v31 = vld [vmem:[%s1070_s3 + $0x68] sm:$0xff] (!%p191_p2)   ;;  %v888_v38 = vld [vmem:[%s1070_s3 + $0x70] sm:$0xff] (!%p191_p2)  }
   0xb   : > { %815 = vmatpush3.bf16.msra.mxu0 (!%p191_p2), %v869_v2  ;;  %v877_v37 = vld [vmem:[%s1070_s3 + $0x80] sm:$0xff] (!%p191_p2)   ;;  %v879_v39 = vld [vmem:[%s1070_s3 + $0x88] sm:$0xff] (!%p191_p2)   ;;  %v890_v40 = vld [vmem:[%s1070_s3 + $0x78] sm:$0xff] (!%p191_p2)  }
   0xc   : > { %816 = vmatprep.subr.bf16.mxu0 (!%p191_p2), %v900_v1  ;;  %v881_v43 = vld [vmem:[%s1070_s3 + $0x90] sm:$0xff] (!%p191_p2)   ;;  %v883_v45 = vld [vmem:[%s1070_s3 + $0x98] sm:$0xff] (!%p191_p2)   ;;  %v885_v46 = vld [vmem:[%s1070_s3 + $0xa0] sm:$0xff] (!%p191_p2)  }
   0xd   : > { %s1074_s19 = smov (!%p222_p3, %s721_s19), 1  ;;  %795 = vmatpush3.bf16.msra.mxu1 %v878_v13  ;;  %v887_v47 = vld [vmem:[%s1070_s3 + $0xa8] sm:$0xff]   ;;  %v889_v48 = vld [vmem:[%s1070_s3 + $0xb0] sm:$0xff]   ;;  %v891_v51 = vld [vmem:[%s1070_s3 + $0xb8] sm:$0xff]  }
   0xe   : > { %s759_s26 = sshll.u32 %s1074_s19, 3  ;;  %796 = vmatprep.subr.bf16.mxu1 %v900_v1  ;;  %s760_s30 = sshll.u32 %s1074_s19, 4 }
   0xf   : > { %s226_s29 = scalar_lea.vmem %s1067_s0, %s759_s26  ;;  %817 = vmatpush3.bf16.msra.mxu0 %v870_v3  ;;  %s231_s8 = scalar_lea.vmem %s1071_s4, %s760_s30 }
  0x10   : > { %v762_v5 = vld [vmem:[%s226_s29] sm:$0xff]   ;;  %818 = vmatprep.subr.bf16.mxu0 %v900_v1  ;;  %s730_s9 = sshll.u32 %s1074_s19, 1 }
  0x11   : > { %v763_v8 = vunpack.c.l.bf16 %v762_v5  ;;  %v764_v9 = vunpack.c.h.bf16 %v762_v5  ;;  %797 = vmatpush3.bf16.msra.mxu1 %v880_v17  ;;  %s235_s12 = scalar_lea.vmem %s1072_s5, %s730_s9 }
  0x12   : > { %798 = vmatprep.subr.bf16.mxu1 %v900_v1 }
  0x13   : > { %v248_v11 = vmul.f32 %v763_v8, %v731_v6  ;;  %v249_v12 = vmul.f32 %v764_v9, %v731_v6  ;;  %819 = vmatpush3.bf16.msra.mxu0 %v871_v7 }
  0x14   : > { %820 = vmatprep.subr.bf16.mxu0 %v900_v1 }
  0x15   : > { %v257_v15 = vadd.f32 %v732_v10, %v248_v11  ;;  %v258_v16 = vadd.f32 %v732_v10, %v249_v12  ;;  %799 = vmatpush3.bf16.msra.mxu1 %v882_v22 }
  0x16   : > { %800 = vmatprep.subr.bf16.mxu1 %v900_v1 }
  0x17   : > { %v259_v19 = vmax.f32 %v257_v15, 0.0  ;;  %v260_v20 = vmax.f32 %v258_v16, 0.0  ;;  %821 = vmatpush3.bf16.msra.mxu0 %v872_v14 }
  0x18   : > { %822 = vmatprep.subr.bf16.mxu0 %v900_v1 }
  0x19   : > { %v261_v21 = vpack.c.bf16 %v260_v20, %v259_v19  ;;  %801 = vmatpush3.bf16.msra.mxu1 %v884_v27 }
  0x1a   : > { %802 = vmatprep.subr.bf16.mxu1 %v900_v1 }
  0x1b   : > { %v263_v24 = vshrl.u32 %v261_v21, 16  ;;  %v266_v25 = vshll.u32 %v261_v21, 16  ;;  %823 = vmatpush3.bf16.msra.mxu0 %v873_v18 }
  0x1c   : > { %824 = vmatprep.subr.bf16.mxu0 %v900_v1 }
  0x1d   : > { %v265_v26 = vrot.slane %v263_v24, 7  ;;  %803 = vmatpush3.bf16.msra.mxu1 %v886_v31 }
  0x1e   : > { %804 = vmatprep.subr.bf16.mxu1 %v900_v1 }
  0x1f   : > { %v268_v28 = vor.u32 %v266_v25, %v265_v26  ;;  %825 = vmatpush3.bf16.msra.mxu0 %v874_v23  ;;  %v275_v32 = vsel %vm273_vm3, %v265_v26, 0 }
  0x20   : > { %826 = vmatprep.subr.bf16.mxu0 %v900_v1  ;;  %v317_v36 = vshll.u32 %v275_v32, 16  ;;  %v520_v50 = vrot.slane %v275_v32, 1 }
  0x21   : > { %v274_v30 = vsel %vm273_vm3, 0, %v268_v28  ;;  %805 = vmatpush3.bf16.msra.mxu1 %v888_v38 }
  0x22   : > { %v312_v33 = vshll.u32 %v274_v30, 16  ;;  %v310_v34 = vshrl.u32 %v274_v30, 16  ;;  %v319_v42 = vrot.slane %v317_v36, 1  ;;  %806 = vmatprep.subr.bf16.mxu1 %v900_v1  ;;  %v519_v49 = vrot.slane %v274_v30, 1 }
  0x23   : > { %827 = vmatpush3.bf16.msra.mxu0 %v875_v29 }
  0x24   : > { %v314_v35 = vrot.slane %v312_v33, 1  ;;  %832 = vmatprep.subr.bf16.mxu0 %v900_v1  ;;  %v521_v52 = vsel %vm518_vm5, %v519_v49, %v520_v50 }
  0x25   : > { %807 = vmatpush3.bf16.msra.mxu1 %v890_v40 }
  0x26   : > { %829 = vmatmul.mubr.bf16.vlgmr.msra.gmra.mrb[0].mxu0 %v274_v30  ;;  %v315_v41 = vor.u32 %v314_v35, %v310_v34 }
  0x27   : > { %833 = vmatpush3.bf16.msra.mxu0 %v877_v37  ;;  %848 = vmatprep.mubr.msk.bf16.mxu0 %vm901_vm0, %v900_v1 }
  0x28   : > { %834 = vmatprep.subr.bf16.mxu0 %v900_v1  ;;  %v320_v44 = vsel %vm308_vm4, %v315_v41, %v319_v42 }
  0x29   : > { %809 = vmatmul.mubr.bf16.vlgmr.msra.gmra.mrb[0].mxu1 %v320_v44 }
  0x2b   : > { %835 = vmatpush3.bf16.msra.mxu0 %v879_v39 }
  0x2c   : > { %836 = vmatprep.subr.bf16.mxu0 %v900_v1 }
  0x2f   : > { %837 = vmatpush3.bf16.msra.mxu0 %v881_v43 }
  0x30   : > { %838 = vmatprep.subr.bf16.mxu0 %v900_v1 }
  0x33   : > { %839 = vmatpush3.bf16.msra.mxu0 %v883_v45 }
  0x34   : > { %840 = vmatprep.subr.bf16.mxu0 %v900_v1 }
  0x37   : > { %841 = vmatpush3.bf16.msra.mxu0 %v885_v46 }
  0x38   : > { %842 = vmatprep.subr.bf16.mxu0 %v900_v1 }
  0x3b   : > { %843 = vmatpush3.bf16.msra.mxu0 %v887_v47 }
  0x3c   : > { %844 = vmatprep.subr.bf16.mxu0 %v900_v1 }
  0x3f   : > { %845 = vmatpush3.bf16.msra.mxu0 %v889_v48 }
  0x40   : > { %846 = vmatprep.subr.bf16.mxu0 %v900_v1 }
  0x43   : > { %847 = vmatpush3.bf16.msra.mxu0 %v891_v51 }
  0x46   : > { %849 = vmatmul.mubr.bf16.vlgmr.msra.gmra.mrb[0].mxu0 %v521_v52 }
  0xfc   : > { %v404_v53 = vpop.f32.mrb[0].mxu1 }
  0xfd   : > { %v810_v54 = vpop.f32.mrb[1].mxu1 }
  0xfe   : > { %v407_v55 = vpop.f32.mrb[2].mxu1 }
  0xff   : > { %v811_v56 = vpop.f32.mrb[3].mxu1 }
 0x119   : > { %v605_v57 = vpop.f32.mrb[0].mxu0 }
 0x11a   : > { %v852_v58 = vadd.f32 %v605_v57, %v404_v53  ;;  %v850_v59 = vpop.f32.mrb[1].mxu0 }
 0x11b   : > { %v608_v60 = vpop.f32.mrb[2].mxu0 }
 0x11c   : > { %614 = vst [vmem:[%s231_s8] sm:$0xff] %v852_v58  ;;  %v853_v61 = vadd.f32 %v608_v60, %v407_v55  ;;  %v851_v62 = vpop.f32.mrb[3].mxu0  ;;  %v623_v63 = vmul.f32 %v852_v58, %v852_v58 }
 0x11e   : > { %615 = vst [vmem:[%s231_s8 + $0x8] sm:$0xff] %v853_v61  ;;  %v616_v0 = vadd.f32 %v853_v61, %v852_v58  ;;  %v624_v1 = vmul.f32 %v853_v61, %v853_v61 }
 0x120   : > { %v617_v2 = vrot.slane %v616_v0, 4  ;;  %v625_v3 = vadd.f32 %v624_v1, %v623_v63 }
 0x122   : > { %v618_v4 = vadd.f32 %v617_v2, %v616_v0  ;;  %v626_v5 = vrot.slane %v625_v3, 4 }
 0x124   : > { %v619_v6 = vrot.slane %v618_v4, 2  ;;  %v627_v7 = vadd.f32 %v626_v5, %v625_v3 }
 0x126   : > { %v620_v8 = vadd.f32 %v619_v6, %v618_v4  ;;  %v628_v9 = vrot.slane %v627_v7, 2 }
 0x128   : > { %v621_v10 = vrot.slane %v620_v8, 1  ;;  %v629_v11 = vadd.f32 %v628_v9, %v627_v7 }
 0x12a   : > { %v630_v12 = vrot.slane %v629_v11, 1  ;;  %v622_v13 = vadd.f32 %v621_v10, %v620_v8 }
 0x12c   : > { %v631_v14 = vadd.f32 %v630_v12, %v629_v11 }
 0x12e   : > { %v633_v15 = vsel %vm271_vm1, %v622_v13, %v631_v14 }
 0x12f   : > { %634 = vst [vmem:[%s235_s12] sm:$0x3] %v633_v15 }
 0x130 PF: > { %s16_s18 = sadd.s32 1, %s898_s18  }
 0x131   : > { %p13_p4 = scmp.ge.s32.totalorder %s16_s18, 4  }
 0x133   :  { %15 = sbr.rel (!%p13_p4) target bundleno = 1 (0x1), region = 78 }

</bundles_post_ra>
